<compile_context>
chip_gen: v7x
topology: tpu7x:2x2x1
jax: 0.10.0
libtpu: 0.0.40
codegen_flags: <defaults>
</compile_context>

<pallas_src>
import jax
import jax.numpy as jnp
from jax.experimental import pallas as pl
from jax.experimental.pallas import tpu as pltpu

_LANE = 128


def _ng_kgcn_kernel(scal_ref, u_ref, v_ref, r_ref, o_ref):
    """Fused NG_KGCN epilogue for one batch tile (batch on the 128-lane axis).

    scal_ref : SMEM (2,) f32      [xmin, 1/(xmax - xmin + 1e-5)]  (hoisted batch reduction)
    u_ref    : VMEM (D, TB)       u1_g_embeddings tile, native dtype (bf16 in the demo)
    v_ref    : VMEM (D, TB)       i2_g_embeddings tile, native dtype
    r_ref    : VMEM (1, TB) f32   precomputed (out1 + out2 + out3) / 3 tile
    o_ref    : VMEM (1, TB) f32   result tile (lane-dense over the batch)
    """
    # Multiply in the native dtype (bf16 VALU on v6e/v7x); accumulate the D-reduce in f32.
    prod = u_ref[...] * v_ref[...]
    dot = jnp.sum(prod.astype(jnp.float32), axis=0, keepdims=True)      # (1, TB) f32

    # sigmoid written with exp + divide (EUP exp; plain VPU divide).
    out = 1.0 / (1.0 + jnp.exp(-dot))

    # Min-max rescale with the pre-computed batch min and 1/range (SMEM scalars);
    # keeps the kernel purely row-local and therefore tileable / megacore-parallel.
    scaled = 0.5 + (r_ref[...] - scal_ref[0]) * scal_ref[1]

    o_ref[...] = jnp.tanh(out * scaled)


def _pick_batch_tile(bp, tb_max=32768, min_steps=8):
    """Largest 128-multiple tile that keeps >= min_steps grid steps and <= tb_max lanes.

    Double-buffered VMEM footprint at D=32, bf16 embeddings is ~384 B/row -> ~12.6 MiB
    at tb=32768, comfortably inside every generation's scoped VMEM (incl. v7x 64 MiB).
    """
    tb = pl.cdiv(bp, min_steps)
    tb = pl.cdiv(tb, _LANE) * _LANE          # round up to the 128-lane vreg width
    tb = max(_LANE, min(int(tb), tb_max, bp))
    return int(tb)


def ng_kgcn_forward(u_emb_t, i_emb_t, out1, out2, out3, *, tb_max=32768):
    """Fused tail of NG_KGCN.forward.

    u_emb_t, i_emb_t : (D, B) feature-major embeddings (any float dtype, kept native in
                       HBM).  Upstream NGCF/KGCN producers emit this layout directly so
                       the dominant operands are read exactly once — no wrapper-side
                       transpose/pad pass.
    out1/2/3         : (B,) submodule scores.
    Returns (B,) float32.
    """
    D, B = u_emb_t.shape
    assert i_emb_t.shape == (D, B)
    assert out1.shape == (B,) and out2.shape == (B,) and out3.shape == (B,)

    # ---- tiny XLA pre-pass: per-sample mean of the three scores + batch min/max ----
    r = (out1.astype(jnp.float32) + out2.astype(jnp.float32) + out3.astype(jnp.float32)) / 3.0
    xmin = jnp.min(r)
    xmax = jnp.max(r)
    inv_range = 1.0 / (xmax - xmin + 1e-5)
    scalars = jnp.stack([xmin, inv_range])                               # (2,) f32 -> SMEM
    r2d = r.reshape(1, B)                                                # lane-major row

    # ---- pad only up to the 128-lane width (no-op for lane-aligned batches) ----
    Bp = pl.cdiv(B, _LANE) * _LANE
    pad = Bp - B
    if pad:
        # Only hit when B is not 128-aligned (e.g. the tiny demo); kept minimal because
        # each jnp.pad is an extra HBM pass over the operand.
        u_emb_t = jnp.pad(u_emb_t, ((0, 0), (0, pad)))
        i_emb_t = jnp.pad(i_emb_t, ((0, 0), (0, pad)))
        r2d = jnp.pad(r2d, ((0, 0), (0, pad)))

    tb = _pick_batch_tile(Bp, tb_max=tb_max)
    grid = (pl.cdiv(Bp, tb),)   # ragged final tile (if any) is per-lane safe

    res = pl.pallas_call(
        _ng_kgcn_kernel,
        out_shape=jax.ShapeDtypeStruct((1, Bp), jnp.float32),
        grid=grid,
        in_specs=[
            pl.BlockSpec(memory_space=pltpu.MemorySpace.SMEM),           # [xmin, 1/range]
            pl.BlockSpec((D, tb), lambda i: (0, i)),                     # u1 embeddings tile
            pl.BlockSpec((D, tb), lambda i: (0, i)),                     # i2 embeddings tile
            pl.BlockSpec((1, tb), lambda i: (0, i)),                     # precomputed r tile
        ],
        out_specs=pl.BlockSpec((1, tb), lambda i: (0, i)),
        compiler_params=pltpu.CompilerParams(
            # Megacore: both TensorCores take half the batch tiles; no-op on 1-TC parts.
            dimension_semantics=("parallel",),
            # Well above the ~12.6 MiB double-buffered footprint at tb=32768, below
            # v7x's 64 MiB physical VMEM (v5e's 16 MiB default would be too tight).
            vmem_limit_bytes=48 * 1024 * 1024,
        ),
    )(scalars, u_emb_t, i_emb_t, r2d)

    return res[0, :B]


def _reference(u_emb, i_emb, out1, out2, out3):
    """Pure-JAX mirror of the PyTorch forward (sample-major (B, D) inputs, f32 math)."""
    u = u_emb.astype(jnp.float32)
    v = i_emb.astype(jnp.float32)
    out = jax.nn.sigmoid(jnp.sum(u * v, axis=-1))
    r = (out1 + out2 + out3) / 3.0
    xmax, xmin = jnp.max(r), jnp.min(r)
    r = 0.5 + 1.0 / (xmax - xmin + 1e-5) * (r - xmin)
    return jnp.tanh(out * r)


if __name__ == "__main__":
    # Small deterministic synthetic shapes: batch=8 samples, e_dim=32 (module default).
    B, D = 8, 32
    key = jax.random.PRNGKey(0)
    k_u, k_i, k1, k2, k3 = jax.random.split(key, 5)

    # TODO(synk): u1/i2 embeddings and out1/out2/out3 come from external submodules
    # (NGCF, KGCN, Course_match, User_choice, Course_preference) that are not defined in
    # the reference source; they are synthesized deterministically here.  The upstream
    # producers emit feature-major (D, B) activations (per the perf review) and keep them
    # bf16 in HBM; the kernel accumulates in f32.
    u1_g_embeddings_t = jax.random.normal(k_u, (D, B), dtype=jnp.float32).astype(jnp.bfloat16)
    i2_g_embeddings_t = jax.random.normal(k_i, (D, B), dtype=jnp.float32).astype(jnp.bfloat16)
    out1 = jax.random.uniform(k1, (B,), dtype=jnp.float32)
    out2 = jax.random.uniform(k2, (B,), dtype=jnp.float32)
    out3 = jax.random.uniform(k3, (B,), dtype=jnp.float32)

    result = ng_kgcn_forward(u1_g_embeddings_t, i2_g_embeddings_t, out1, out2, out3)
    jax.block_until_ready(result)

    ref = _reference(u1_g_embeddings_t.T, i2_g_embeddings_t.T, out1, out2, out3)
    assert result.shape == (B,)
    # Tolerance covers the bf16 u*v products inside the kernel vs. the f32-product reference.
    assert jnp.allclose(result, ref, atol=2e-2, rtol=2e-2), (result, ref)
    print("KERNEL_OK")
</pallas_src>

<mosaic_0001>
module attributes {stable_mosaic.version = 11 : i64} {
  func.func @_ng_kgcn_kernel(%arg0: i32, %arg1: memref<2xf32, #tpu.memory_space<smem>>, %arg2: memref<32x128xbf16, #tpu.memory_space<vmem>>, %arg3: memref<32x128xbf16, #tpu.memory_space<vmem>>, %arg4: memref<1x128xf32, #tpu.memory_space<vmem>>, %arg5: memref<1x128xf32, #tpu.memory_space<vmem>>) attributes {dimension_semantics = [#tpu.dimension_semantics<parallel>], iteration_bounds = array<i64: 1>, scalar_prefetch = 0 : i64, scratch_operands = 0 : i64, tpu.core_type = #tpu.core_type<tc>, window_params = [{transform_indices = @transform_0, window_bounds = array<i64: 2>}, {transform_indices = @transform_1, window_bounds = array<i64: 32, 128>}, {transform_indices = @transform_2, window_bounds = array<i64: 32, 128>}, {transform_indices = @transform_3, window_bounds = array<i64: 1, 128>}, {transform_indices = @transform_4, window_bounds = array<i64: 1, 128>}]} {
    %c0 = arith.constant 0 : index
    %c0_0 = arith.constant 0 : index
    %0 = vector.load %arg2[%c0, %c0_0] : memref<32x128xbf16, #tpu.memory_space<vmem>>, vector<32x128xbf16>
    %c0_1 = arith.constant 0 : index
    %c0_2 = arith.constant 0 : index
    %1 = vector.load %arg3[%c0_1, %c0_2] : memref<32x128xbf16, #tpu.memory_space<vmem>>, vector<32x128xbf16>
    %2 = arith.mulf %0, %1 : vector<32x128xbf16>
    %3 = arith.extf %2 : vector<32x128xbf16> to vector<32x128xf32>
    %cst = arith.constant dense<0.000000e+00> : vector<128xf32>
    %4 = vector.multi_reduction <add>, %3, %cst [0] : vector<32x128xf32> to vector<128xf32>
    %5 = vector.shape_cast %4 : vector<128xf32> to vector<1x128xf32>
    %cst_3 = arith.constant 0.000000e+00 : f32
    %6 = vector.broadcast %cst_3 : f32 to vector<1x128xf32>
    %7 = arith.subf %6, %5 : vector<1x128xf32>
    %8 = math.exp %7 : vector<1x128xf32>
    %cst_4 = arith.constant 1.000000e+00 : f32
    %9 = vector.broadcast %cst_4 : f32 to vector<1x128xf32>
    %10 = arith.addf %9, %8 : vector<1x128xf32>
    %cst_5 = arith.constant 1.000000e+00 : f32
    %11 = vector.broadcast %cst_5 : f32 to vector<1x128xf32>
    %12 = arith.divf %11, %10 : vector<1x128xf32>
    %c0_6 = arith.constant 0 : index
    %c0_7 = arith.constant 0 : index
    %13 = vector.load %arg4[%c0_6, %c0_7] : memref<1x128xf32, #tpu.memory_space<vmem>>, vector<1x128xf32>
    %c0_8 = arith.constant 0 : index
    %14 = memref.load %arg1[%c0_8] : memref<2xf32, #tpu.memory_space<smem>>
    %15 = vector.broadcast %14 : f32 to vector<1x128xf32>
    %16 = arith.subf %13, %15 : vector<1x128xf32>
    %c1 = arith.constant 1 : index
    %17 = memref.load %arg1[%c1] : memref<2xf32, #tpu.memory_space<smem>>
    %18 = vector.broadcast %17 : f32 to vector<1x128xf32>
    %19 = arith.mulf %16, %18 : vector<1x128xf32>
    %cst_9 = arith.constant 5.000000e-01 : f32
    %20 = vector.broadcast %cst_9 : f32 to vector<1x128xf32>
    %21 = arith.addf %20, %19 : vector<1x128xf32>
    %22 = arith.mulf %12, %21 : vector<1x128xf32>
    %23 = math.tanh %22 : vector<1x128xf32>
    %c0_10 = arith.constant 0 : index
    %c0_11 = arith.constant 0 : index
    %24 = vector.load %arg5[%c0_10, %c0_11] : memref<1x128xf32, #tpu.memory_space<vmem>>, vector<1x128xf32>
    tpu.vector_store %arg5[%c0_10, %c0_11], %23 {strides = array<i32>} : memref<1x128xf32, #tpu.memory_space<vmem>>, vector<1x128xf32>,
    return
  }
  func.func @transform_0(%arg0: i32) -> i32 {
    %c0_i32 = arith.constant 0 : i32
    %c0_i32_0 = arith.constant 0 : i32
    return %c0_i32 : i32
  }
  func.func @transform_1(%arg0: i32) -> (i32, i32) {
    %c0_i32 = arith.constant 0 : i32
    %c0_i32_0 = arith.constant 0 : i32
    return %c0_i32, %arg0 : i32, i32
  }
  func.func @transform_2(%arg0: i32) -> (i32, i32) {
    %c0_i32 = arith.constant 0 : i32
    %c0_i32_0 = arith.constant 0 : i32
    return %c0_i32, %arg0 : i32, i32
  }
  func.func @transform_3(%arg0: i32) -> (i32, i32) {
    %c0_i32 = arith.constant 0 : i32
    %c0_i32_0 = arith.constant 0 : i32
    return %c0_i32, %arg0 : i32, i32
  }
  func.func @transform_4(%arg0: i32) -> (i32, i32) {
    %c0_i32 = arith.constant 0 : i32
    %c0_i32_0 = arith.constant 0 : i32
    return %c0_i32, %arg0 : i32, i32
  }
}

</mosaic_0001>

<bundles_post_ra>
// kernel: tpu_custom_call.1
= control target key start
LH: loop header
LB: loop body
LE: loop exit
PB: predicated region body
PF: predicated region fallthrough
CT: control target
= control target key end

     0   :  { %9 = vsyncpa [#allocation5], 0  ;;  %s295_s0 = inlined_call_operand.hbm [shape: f32[2], index: 0, kind: input, shape index: {}]   ;;  %s296_s1 = inlined_call_operand.hbm [shape: bf16[32,128], index: 1, kind: input, shape index: {}]   ;;  %s297_s2 = inlined_call_operand.hbm [shape: bf16[32,128], index: 2, kind: input, shape index: {}]   ;;  %s298_s3 = inlined_call_operand.vmem [shape: f32[1,128], index: 3, kind: input, shape index: {}]   ;;  %s299_s4 = inlined_call_operand.hbm [shape: f32[1,128], index: 4, kind: output, shape index: {}]  }
   0x1   :  { %10 = vsyncpa [#allocation3], 0 }
   0x2   :  { %11 = vsyncpa [#allocation8], 0 }
   0x3   :  { %12 = vsyncpa [#allocation4], 0  ;;  %s129_s17 = scalar_lea.hbm %s295_s0, 16 }
   0x4   :  { %p130_p0 = scmp.ne.s32.totalorder %s295_s0, %s129_s17  ;;  %p133_p1 = scmp.lt.u32.totalorder %s129_s17, %s295_s0 }
   0x6   :  { %p135_p2 = pnand %p133_p1, %p130_p0 }
   0x8   :  { %138 = shalt.err (!%p135_p2)
}
   0x9   :  { %s213_s22 = smov [#allocation2]   ;;  %s214_s25 = smov [#allocation6]  }
   0xa   :  { %20 = dma.hbm_to_smem %s295_s0, 16, %s213_s22, [#allocation5]  }
   0xb   :  { %s26_s26 = sshll.u32 %s214_s25, 4  ;;  %s139_s29 = scalar_lea.hbm %s296_s1, 256  ;;  %s27_s26 = int_to_ptr.vmem [resolvable:$true] %s26_s26 }
   0xc   :  { %p140_p3 = scmp.ne.s32.totalorder %s296_s1, %s139_s29  ;;  %p143_p4 = scmp.lt.u32.totalorder %s139_s29, %s296_s1 }
   0xe   :  { %p145_p5 = pnand %p143_p4, %p140_p3 }
  0x10   :  { %148 = shalt.err (!%p145_p5)
}
  0x11   :  { %s149_s8 = scalar_lea.vmem %s27_s26, 256  ;;  %p154_p7 = scmp.lt.s32.totalorder %s27_s26, %s27_s26 }
  0x12   :  { %p150_p6 = scmp.ne.s32.totalorder %s27_s26, %s149_s8  ;;  %p155_p8 = scmp.lt.s32.totalorder %s149_s8, %s149_s8 }
  0x14   :  { %p156_p9 = por %p155_p8, %p154_p7 }
  0x16   :  { %p157_p10 = pnand %p156_p9, %p150_p6 }
  0x18   :  { %160 = shalt.err (!%p157_p10)
}
  0x19   :  { %s215_s0 = smov 64   ;;  %s216_s9 = smov 4  }
  0x1a   :  { %32 = dma.hbm_to_vmem [thread:$0]  %s296_s1, 256, %s27_s26, [#allocation3], %s215_s0, %s215_s0, %s216_s9  }
  0x1b   :  { %s217_s12 = smov [#allocation7]   ;;  %s161_s16 = scalar_lea.hbm %s297_s2, 256 }
  0x1c   :  { %s38_s13 = sshll.u32 %s217_s12, 4  ;;  %p162_p11 = scmp.ne.s32.totalorder %s297_s2, %s161_s16  ;;  %s39_s13 = int_to_ptr.vmem [resolvable:$true] %s38_s13 }
  0x1d   :  { %p165_p12 = scmp.lt.u32.totalorder %s161_s16, %s297_s2 }
  0x1f   :  { %p167_p13 = pnand %p165_p12, %p162_p11 }
  0x21   :  { %170 = shalt.err (!%p167_p13)
}
  0x22   :  { %s171_s21 = scalar_lea.vmem %s39_s13, 256  ;;  %p176_p1 = scmp.lt.s32.totalorder %s39_s13, %s39_s13 }
  0x23   :  { %p172_p0 = scmp.ne.s32.totalorder %s39_s13, %s171_s21  ;;  %p177_p2 = scmp.lt.s32.totalorder %s171_s21, %s171_s21 }
  0x25   :  { %p178_p3 = por %p177_p2, %p176_p1 }
  0x27   :  { %p179_p4 = pnand %p178_p3, %p172_p0 }
  0x29   :  { %182 = shalt.err (!%p179_p4)
}
  0x2a   :  { %44 = dma.hbm_to_vmem [thread:$0]  %s297_s2, 256, %s39_s13, [#allocation8], %s215_s0, %s215_s0, %s216_s9  }
  0x2b   :  { %205 = dma.done.wait [#allocation5], 16  }
  0x2c   :  { %206 = vsyncadd [#allocation5], 4294967280 }
  0x2d   :  { %207 = dma.done.wait [#allocation3], 256  }
  0x2e   :  { %208 = vsyncadd [#allocation3], 4294967040 }
  0x2f   :  { %209 = dma.done.wait [#allocation8], 256  }
  0x30   :  { %210 = vsyncadd [#allocation8], 4294967040 }
  0x31   :  { %56 = sfence }
  0x32   :  { %v57_v0 = vld [vmem:[#allocation6] sm:$0xf]  ;;  %v58_v1 = vld [vmem:[#allocation6 + $0x4] sm:$0xf]  ;;  %v59_v2 = vld [vmem:[#allocation6 + $0x8] sm:$0xf] }
  0x33   :  { %v60_v3 = vld [vmem:[#allocation6 + $0xc] sm:$0xf]  ;;  %v61_v4 = vld [vmem:[#allocation7] sm:$0xf]  ;;  %v62_v5 = vld [vmem:[#allocation7 + $0x4] sm:$0xf] }
  0x34   :  { %v63_v6 = vld [vmem:[#allocation7 + $0x8] sm:$0xf]  ;;  %v64_v7 = vld [vmem:[#allocation7 + $0xc] sm:$0xf]  ;;  %v65_v8 = vmul.bf16 %v61_v4, %v57_v0  ;;  %v66_v9 = vmul.bf16 %v62_v5, %v58_v1  ;;  %s89_s2 = sld [smem:[#allocation2]]  ;;  %s116_s23 = sld [smem:[#allocation2 + $0x1]] }
  0x35   :  { %v67_v10 = vmul.bf16 %v63_v6, %v59_v2  ;;  %v68_v11 = vmul.bf16 %v64_v7, %v60_v3  ;;  %v88_v27 = vld [vmem:[%s298_s3] sm:$0x1]  ;;  %s218_s26 = smov [#allocation9]  }
  0x36   :  { %v69_v12 = vunpack.c.l.bf16 %v65_v8  ;;  %v70_v13 = vunpack.c.l.bf16 %v66_v9  ;;  %s105_s27 = sshll.u32 %s218_s26, 4  ;;  %s106_s27 = int_to_ptr.vmem [resolvable:$true] %s105_s27 }
  0x37   :  { %v71_v14 = vunpack.c.l.bf16 %v67_v10  ;;  %v72_v15 = vunpack.c.l.bf16 %v68_v11  ;;  %s183_s28 = scalar_lea.vmem %s106_s27, 16  ;;  %s187_s29 = scalar_lea.vmem %s106_s27, 32 }
  0x38   :  { %v73_v16 = vadd.f32 %v70_v13, %v69_v12  ;;  %p184_p5 = scmp.ne.s32.totalorder %s106_s27, %s183_s28  ;;  %p188_p6 = scmp.lt.s32.totalorder %s106_s27, %s106_s27 }
  0x39   :  { %p189_p7 = scmp.lt.s32.totalorder %s187_s29, %s183_s28 }
  0x3a   :  { %v74_v17 = vadd.f32 %v73_v16, %v71_v14  ;;  %v90_v28 = vstv %s89_s2  ;;  %v93_v32 = vstv %s116_s23 }
  0x3b   :  { %v91_v31 = vsub.f32 %v88_v27, %v90_v28  ;;  %p190_p8 = por %p189_p7, %p188_p6 }
  0x3c   :  { %v75_v18 = vadd.f32 %v74_v17, %v72_v15 }
  0x3d   :  { %v94_v33 = vmul.f32 %v93_v32, %v91_v31  ;;  %p191_p9 = pnand %p190_p8, %p184_p5 }
  0x3e   :  { %v76_v19 = vrot.slane %v75_v18, 4 }
  0x3f   :  { %v95_v34 = vadd.f32 0.5, %v94_v33 }
  0x40   :  { %v77_v20 = vadd.f32 %v76_v19, %v75_v18 }
  0x42   :  { %v78_v21 = vrot.slane %v77_v20, 2 }
  0x44   :  { %v79_v22 = vadd.f32 %v78_v21, %v77_v20 }
  0x46   :  { %v80_v23 = vrot.slane %v79_v22, 1 }
  0x48   :  { %v81_v24 = vadd.f32 %v80_v23, %v79_v22 }
  0x4a   :  { %v82_v25 = vsub.f32 0.0, %v81_v24 }
  0x4c   :  { %v83_v26 = vmul.f32 1.442695, %v82_v25 }
  0x4e   :  { %123 = vpow2.f32 %v83_v26 }
  0x58   :  { %v124_v29 = vpop.eup %123 }
  0x59   :  { %v85_v30 = vadd.f32 1.0, %v124_v29 }
  0x5b   :  { %125 = vrcp.f32 %v85_v30 }
  0x65   :  { %v126_v35 = vpop.eup %125 }
  0x66   :  { %v96_v36 = vmul.f32 %v126_v35, %v95_v34 }
  0x68   :  { %127 = vtanh.f32 %v96_v36 }
  0x72   :  { %v128_v37 = vpop.eup %127 }
  0x73   :  { %98 = vst [vmem:[#allocation9] sm:$0x1] %v128_v37 }
  0x74   :  { %194 = shalt.err (!%p191_p9)
}
  0x75   :  { %s195_s5 = scalar_lea.hbm %s299_s4, 16 }
  0x76   :  { %p196_p10 = scmp.ne.s32.totalorder %s299_s4, %s195_s5  ;;  %p199_p11 = scmp.lt.u32.totalorder %s195_s5, %s299_s4 }
  0x78   :  { %p201_p12 = pnand %p199_p11, %p196_p10 }
  0x7a   :  { %204 = shalt.err (!%p201_p12)
}
  0x7b   :  { %108 = dma.vmem_to_hbm [thread:$0]  %s106_s27, 16, %s299_s4, [#allocation4]  }
  0x7c   :  { %211 = dma.done.wait [#allocation4], 16  }
  0x7d   :  { %212 = vsyncadd [#allocation4], 4294967280 }
  0x7e   :  { %112 = vsyncpa [#allocation3], 1 }
  0x7f   :  { %113 = vsyncpa [#allocation8], 1 }
  0x80   :  { %114 = vsyncpa [#allocation4], 1 }
  0x81   :  { %115 = vsyncpa [#allocation5], 1 }

</bundles_post_ra>
